<compile_context>
chip_gen: v5e
topology: v5e:2x2
jax: 0.10.0
libtpu: 0.0.40
codegen_flags: <defaults>
</compile_context>

<pallas_src>
import functools

import jax
import jax.numpy as jnp
from jax import lax
from jax.experimental import pallas as pl
from jax.experimental.pallas import tpu as pltpu

_LANE = 128


def _wbce_kernel(y_pred_ref, y_true_ref, pos_w_ref, out_ref, acc_ref,
                 *, n_valid, inv_total):
    """One grid step over a (C, tb) class-major tile of logits."""
    pid = pl.program_id(0)

    @pl.when(pid == 0)
    def _init():
        acc_ref[...] = jnp.zeros_like(acc_ref)

    x = y_pred_ref[...].astype(jnp.float32)        # (C, tb) logits (class-major)
    labels = y_true_ref[...]                       # (1, tb) int32 class ids
    pw = pos_w_ref[...].astype(jnp.float32)        # (C, 1)  pos_weight

    c, tb = x.shape

    # one_hot(y_true, C) as a broadcast compare: row r <-> class r.
    class_ids = lax.broadcasted_iota(jnp.int32, (c, tb), dimension=0)
    is_pos = class_ids == labels                   # (C, tb) bool

    # Numerically stable softplus(-x) = max(-x, 0) + log1p(exp(-|x|))
    sp_neg = jnp.maximum(-x, 0.0) + jnp.log1p(jnp.exp(-jnp.abs(x)))

    # BCEWithLogits with pos_weight, one select per element:
    #   y==1 -> pw * softplus(-x)
    #   y==0 -> softplus(x) = x + softplus(-x)
    loss = jnp.where(is_pos, pw * sp_neg, x + sp_neg)

    # Mask out padded batch columns so the mean divisor stays original B*C.
    col = pid * tb + lax.broadcasted_iota(jnp.int32, (c, tb), dimension=1)
    loss = jnp.where(col < n_valid, loss, 0.0)

    # Vector partial-sum accumulation (pure VPU add, no per-step cross-lane reduce).
    acc_ref[...] += loss

    @pl.when(pid == pl.num_programs(0) - 1)
    def _finalize():
        out_ref[0, 0] = jnp.sum(acc_ref[...]) * inv_total


def weighted_bce_with_logits_loss(y_pred, y_true, pos_weight, *, max_tile_b=8192):
    """y_pred: (B, C=2) float logits; y_true: (B,) int class ids; pos_weight: (C,).

    Returns the scalar mean of BCEWithLogitsLoss(pos_weight) over one_hot(y_true).
    """
    b, c = y_pred.shape

    # Layout plumbing only (no compute hoisted into the wrapper):
    #   class-major logits and a lane-dense label row.
    x_t = jnp.transpose(y_pred)                          # (C, B)
    labels = y_true.astype(jnp.int32).reshape(1, b)      # (1, B)
    pw = pos_weight.astype(jnp.float32).reshape(c, 1)    # (C, 1)

    # Lane-dense tile along the batch axis (multiple of 128), pad B up to it.
    tb = min(int(max_tile_b), pl.cdiv(b, _LANE) * _LANE)
    b_pad = pl.cdiv(b, tb) * tb
    if b_pad != b:
        x_t = jnp.pad(x_t, ((0, 0), (0, b_pad - b)))
        labels = jnp.pad(labels, ((0, 0), (0, b_pad - b)))
    num_tiles = b_pad // tb

    kernel = functools.partial(
        _wbce_kernel, n_valid=b, inv_total=1.0 / float(b * c))

    out = pl.pallas_call(
        kernel,
        out_shape=jax.ShapeDtypeStruct((1, 1), jnp.float32),
        grid=(num_tiles,),
        in_specs=[
            pl.BlockSpec((c, tb), lambda i: (0, i)),     # logits tile (class-major)
            pl.BlockSpec((1, tb), lambda i: (0, i)),     # label tile (lane-dense)
            pl.BlockSpec((c, 1), lambda i: (0, 0)),      # pos_weight (resident)
        ],
        out_specs=pl.BlockSpec(memory_space=pltpu.SMEM),  # scalar result
        scratch_shapes=[pltpu.VMEM((c, tb), jnp.float32)],
        compiler_params=pltpu.CompilerParams(
            dimension_semantics=("arbitrary",),           # reduction axis
            vmem_limit_bytes=32 * 1024 * 1024,            # safe on v5e/v6e/v7x
        ),
    )(x_t, labels, pw)
    return out[0, 0]


def _reference(y_pred, y_true, pos_weight):
    """Pure-JAX reference matching torch BCEWithLogitsLoss(pos_weight) on one_hot."""
    c = y_pred.shape[1]
    y = jax.nn.one_hot(y_true, c, dtype=jnp.float32)
    sp_neg = jnp.maximum(-y_pred, 0.0) + jnp.log1p(jnp.exp(-jnp.abs(y_pred)))
    return jnp.mean((1.0 - y) * y_pred + (pos_weight[None, :] * y + (1.0 - y)) * sp_neg)


if __name__ == "__main__":
    key = jax.random.PRNGKey(0)
    k1, k2, k3, k4 = jax.random.split(key, 4)

    # Deterministic "parameter" from the module's __init__ (pos_weight), shape (2,)
    pos_weight = jnp.array([1.0, 3.0], dtype=jnp.float32)

    # Small case consistent with the module's forward: (B, 2) logits, (B,) class ids.
    B, C = 8, 2
    y_pred = jax.random.normal(k1, (B, C), dtype=jnp.float32)
    y_true = jax.random.randint(k2, (B,), 0, 2, dtype=jnp.int32)

    loss = weighted_bce_with_logits_loss(y_pred, y_true, pos_weight)
    jax.block_until_ready(loss)
    ref = _reference(y_pred, y_true, pos_weight)
    assert jnp.allclose(loss, ref, atol=1e-5, rtol=1e-5), (loss, ref)

    # Second small case exercising the multi-tile grid + padding mask path.
    B2 = 333
    y_pred2 = jax.random.normal(k3, (B2, C), dtype=jnp.float32)
    y_true2 = jax.random.randint(k4, (B2,), 0, 2, dtype=jnp.int32)
    loss2 = weighted_bce_with_logits_loss(y_pred2, y_true2, pos_weight, max_tile_b=128)
    jax.block_until_ready(loss2)
    ref2 = _reference(y_pred2, y_true2, pos_weight)
    assert jnp.allclose(loss2, ref2, atol=1e-5, rtol=1e-5), (loss2, ref2)

    print("KERNEL_OK")
</pallas_src>

<mosaic_0001>
module attributes {stable_mosaic.version = 11 : i64} {
  func.func @_wbce_kernel(%arg0: i32, %arg1: memref<2x128xf32, #tpu.memory_space<vmem>>, %arg2: memref<1x128xi32, #tpu.memory_space<vmem>>, %arg3: memref<2x1xf32, #tpu.memory_space<vmem>>, %arg4: memref<1x1xf32, #tpu.memory_space<smem>>, %arg5: memref<2x128xf32, #tpu.memory_space<vmem>>) attributes {dimension_semantics = [#tpu.dimension_semantics<arbitrary>], iteration_bounds = array<i64: 1>, scalar_prefetch = 0 : i64, scratch_operands = 1 : i64, tpu.core_type = #tpu.core_type<tc>, window_params = [{transform_indices = @transform_0, window_bounds = array<i64: 2, 128>}, {transform_indices = @transform_1, window_bounds = array<i64: 1, 128>}, {pipeline_mode = #tpu.pipeline_mode<synchronous>, transform_indices = @transform_2, window_bounds = array<i64: 2, 1>}, {transform_indices = @transform_3, window_bounds = array<i64: 1, 1>}]} {
    %c0_i32 = arith.constant 0 : i32
    %0 = arith.cmpi eq, %arg0, %c0_i32 : i32
    %1 = arith.extui %0 : i1 to i32
    %c0_i32_0 = arith.constant 0 : i32
    %2 = arith.cmpi ne, %1, %c0_i32_0 : i32
    scf.if %2 {
      %cst_15 = arith.constant 0.000000e+00 : f32
      %37 = vector.broadcast %cst_15 : f32 to vector<2x128xf32>
      %c0_16 = arith.constant 0 : index
      %c0_17 = arith.constant 0 : index
      %38 = vector.load %arg5[%c0_16, %c0_17] : memref<2x128xf32, #tpu.memory_space<vmem>>, vector<2x128xf32>
      tpu.vector_store %arg5[%c0_16, %c0_17], %37 {strides = array<i32>} : memref<2x128xf32, #tpu.memory_space<vmem>>, vector<2x128xf32>,
    } else {
    }
    %c0 = arith.constant 0 : index
    %c0_1 = arith.constant 0 : index
    %3 = vector.load %arg1[%c0, %c0_1] : memref<2x128xf32, #tpu.memory_space<vmem>>, vector<2x128xf32>
    %c0_2 = arith.constant 0 : index
    %c0_3 = arith.constant 0 : index
    %4 = vector.load %arg2[%c0_2, %c0_3] : memref<1x128xi32, #tpu.memory_space<vmem>>, vector<1x128xi32>
    %c0_4 = arith.constant 0 : index
    %c0_5 = arith.constant 0 : index
    %5 = vector.load %arg3[%c0_4, %c0_5] : memref<2x1xf32, #tpu.memory_space<vmem>>, vector<2x1xf32>
    %6 = tpu.iota {dimensions = array<i32: 0>} : vector<2x128xi32>
    %7 = vector.broadcast %4 : vector<1x128xi32> to vector<2x128xi32>
    %8 = arith.cmpi eq, %6, %7 : vector<2x128xi32>
    %cst = arith.constant 0.000000e+00 : f32
    %9 = vector.broadcast %cst : f32 to vector<2x128xf32>
    %10 = arith.subf %9, %3 : vector<2x128xf32>
    %cst_6 = arith.constant 0.000000e+00 : f32
    %11 = vector.broadcast %cst_6 : f32 to vector<2x128xf32>
    %12 = arith.maximumf %10, %11 : vector<2x128xf32>
    %13 = math.absf %3 : vector<2x128xf32>
    %cst_7 = arith.constant 0.000000e+00 : f32
    %14 = vector.broadcast %cst_7 : f32 to vector<2x128xf32>
    %15 = arith.subf %14, %13 : vector<2x128xf32>
    %16 = math.exp %15 : vector<2x128xf32>
    %17 = math.log1p %16 : vector<2x128xf32>
    %18 = arith.addf %12, %17 : vector<2x128xf32>
    %19 = vector.broadcast %5 : vector<2x1xf32> to vector<2x128xf32>
    %20 = arith.mulf %19, %18 : vector<2x128xf32>
    %21 = arith.addf %3, %18 : vector<2x128xf32>
    %22 = arith.select %8, %20, %21 : vector<2x128xi1>, vector<2x128xf32>
    %c128_i32 = arith.constant 128 : i32
    %23 = arith.muli %arg0, %c128_i32 : i32
    %24 = tpu.iota {dimensions = array<i32: 1>} : vector<2x128xi32>
    %25 = vector.broadcast %23 : i32 to vector<2x128xi32>
    %26 = arith.addi %25, %24 : vector<2x128xi32>
    %c8_i32 = arith.constant 8 : i32
    %27 = vector.broadcast %c8_i32 : i32 to vector<2x128xi32>
    %28 = arith.cmpi slt, %26, %27 : vector<2x128xi32>
    %cst_8 = arith.constant 0.000000e+00 : f32
    %29 = vector.broadcast %cst_8 : f32 to vector<2x128xf32>
    %30 = arith.select %28, %22, %29 : vector<2x128xi1>, vector<2x128xf32>
    %c0_9 = arith.constant 0 : index
    %c0_10 = arith.constant 0 : index
    %31 = vector.load %arg5[%c0_9, %c0_10] : memref<2x128xf32, #tpu.memory_space<vmem>>, vector<2x128xf32>
    %32 = arith.addf %31, %30 : vector<2x128xf32>
    %c0_11 = arith.constant 0 : index
    %c0_12 = arith.constant 0 : index
    %33 = vector.load %arg5[%c0_11, %c0_12] : memref<2x128xf32, #tpu.memory_space<vmem>>, vector<2x128xf32>
    tpu.vector_store %arg5[%c0_11, %c0_12], %32 {strides = array<i32>} : memref<2x128xf32, #tpu.memory_space<vmem>>, vector<2x128xf32>,
    %c0_i32_13 = arith.constant 0 : i32
    %34 = arith.cmpi eq, %arg0, %c0_i32_13 : i32
    %35 = arith.extui %34 : i1 to i32
    %c0_i32_14 = arith.constant 0 : i32
    %36 = arith.cmpi ne, %35, %c0_i32_14 : i32
    scf.if %36 {
      %c0_15 = arith.constant 0 : index
      %c0_16 = arith.constant 0 : index
      %37 = vector.load %arg5[%c0_15, %c0_16] : memref<2x128xf32, #tpu.memory_space<vmem>>, vector<2x128xf32>
      %38 = vector.shape_cast %37 : vector<2x128xf32> to vector<1x2x128xf32>
      %cst_17 = arith.constant dense<0.000000e+00> : vector<1xf32>
      %39 = vector.multi_reduction <add>, %38, %cst_17 [1, 2] : vector<1x2x128xf32> to vector<1xf32>
      %40 = vector.shape_cast %39 : vector<1xf32> to vector<1x1x1xf32>
      %41 = vector.extract %40[0, 0, 0] : f32 from vector<1x1x1xf32>
      %cst_18 = arith.constant 6.250000e-02 : f32
      %42 = arith.mulf %41, %cst_18 : f32
      %c0_19 = arith.constant 0 : index
      %c0_20 = arith.constant 0 : index
      %43 = memref.load %arg4[%c0_19, %c0_20] : memref<1x1xf32, #tpu.memory_space<smem>>
      memref.store %42, %arg4[%c0_19, %c0_20] : memref<1x1xf32, #tpu.memory_space<smem>>
    } else {
    }
    return
  }
  func.func @transform_0(%arg0: i32) -> (i32, i32) {
    %c0_i32 = arith.constant 0 : i32
    %c0_i32_0 = arith.constant 0 : i32
    return %c0_i32, %arg0 : i32, i32
  }
  func.func @transform_1(%arg0: i32) -> (i32, i32) {
    %c0_i32 = arith.constant 0 : i32
    %c0_i32_0 = arith.constant 0 : i32
    return %c0_i32, %arg0 : i32, i32
  }
  func.func @transform_2(%arg0: i32) -> (i32, i32) {
    %c0_i32 = arith.constant 0 : i32
    %c0_i32_0 = arith.constant 0 : i32
    %c0_i32_1 = arith.constant 0 : i32
    return %c0_i32, %c0_i32_0 : i32, i32
  }
  func.func @transform_3(%arg0: i32) -> (i32, i32) {
    %c0_i32 = arith.constant 0 : i32
    %c0_i32_0 = arith.constant 0 : i32
    %c0_i32_1 = arith.constant 0 : i32
    return %c0_i32, %c0_i32_0 : i32, i32
  }
}

</mosaic_0001>

<bundles_post_ra>
// kernel: tpu_custom_call.1
= control target key start
LH: loop header
LB: loop body
LE: loop exit
PB: predicated region body
PF: predicated region fallthrough
CT: control target
= control target key end

     0   :  { %v119_v1 = vmov 0   ;;  %s154_s0 = inlined_call_operand.vmem [shape: f32[2,128], index: 0, kind: input, shape index: {}]   ;;  %s155_s1 = inlined_call_operand.vmem [shape: s32[1,128], index: 1, kind: input, shape index: {}]   ;;  %s156_s2 = inlined_call_operand.vmem [shape: f32[2,1], index: 2, kind: input, shape index: {}]   ;;  %s157_s3 = inlined_call_operand.hbm [shape: f32[1,1], index: 3, kind: output, shape index: {}]  }
   0x1   :  { %v22_v0 = vld [vmem:[%s156_s2] sm:$0x3]  ;;  %99 = vset.pattern.permute.xlu0 %v119_v1 }
   0x2   :  { %8 = vsyncpa [#allocation4], 0  ;;  %45 = vperm.xlu0 %99, %v22_v0   ;;  %v20_v2 = vld [vmem:[%s154_s0] sm:$0x3]  ;;  %v120_v6 = vmov 0.0   ;;  %v23_v17 = vlaneseq  ;;  %vm65_vm3 = vcmask 1041408  }
   0x3   :  { %v29_v3 = vand.u32 2147483647, %v20_v2  ;;  %19 = vst [vmem:[#allocation2] sm:$0x3] %v120_v6  ;;  %v27_v13 = vsub.f32 0.0, %v20_v2  ;;  %s84_s17 = sshll.u32 %s157_s3, 4  ;;  %s85_s17 = int_to_ptr.hbm [resolvable:$true] %s84_s17 }
   0x4   :  { %v24_v20 = vshrl.u32 %v23_v17, 7  ;;  %v100_v21 = vld [vmem:[%s155_s1] ss:$0 sm:$0xff]  ;;  %v53_v22 = vand.u32 127, %v23_v17  ;;  %s121_s20 = smov [#allocation3]  }
   0x5   :  { %v30_v4 = vsub.f32 0.0, %v29_v3  ;;  %v28_v16 = vmax.f32 %v27_v13, 0.0 }
   0x6   :  { %vm26_vm1 = vcmp.eq.s32.totalorder %v24_v20, %v100_v21  ;;  %vm56_vm2 = vcmp.lt.s32.totalorder %v53_v22, 8 }
   0x7   :  { %v31_v5 = vmul.f32 1.442695, %v30_v4 }
   0x9   :  { %101 = vpow2.f32 %v31_v5 }
   0xa   :  { %v58_v26 = vld [vmem:[#allocation2] sm:$0x3] }
   0xf   :  { %v102_v7 = vpop.eup %101 }
  0x10   :  { %v33_v8 = vadd.f32 1.0, %v102_v7  ;;  %v36_v9 = vmul.f32 -0.5, %v102_v7  ;;  %v39_v12 = vand.u32 2147483647, %v102_v7 }
  0x12   :  { %103 = vlog2.f32 %v33_v8  ;;  %v37_v10 = vadd.f32 1.0, %v36_v9  ;;  %vm40_vm0 = vcmp.lt.f32.partialorder %v39_v12, 0.0004427343 }
  0x14   :  { %v38_v15 = vmul.f32 %v102_v7, %v37_v10 }
  0x18   :  { %v104_v11 = vpop.eup %103 }
  0x19   :  { %v35_v14 = vmul.f32 0.6931472, %v104_v11 }
  0x1b   :  { %v41_v18 = vsel %vm40_vm0, %v38_v15, %v35_v14 }
  0x1c   :  { %v42_v19 = vadd.f32 %v41_v18, %v28_v16 }
  0x1e   :  { %v49_v23 = vadd.f32 %v42_v19, %v20_v2 }
  0x74   :  { %v46_v24 = vpop.permute.xlu0 %45 }
  0x75   :  { %v48_v25 = vmul.f32 %v46_v24, %v42_v19 }
  0x77   :  { %v50_v27 = vsel %vm26_vm1, %v48_v25, %v49_v23 }
  0x78   :  { %v57_v28 = vsel %vm56_vm2, %v50_v27, 0.0 }
  0x79   :  { %v59_v29 = vadd.f32 %v58_v26, %v57_v28 }
  0x7b   :  { %60 = vst [vmem:[#allocation2] sm:$0x3] %v59_v29 }
  0x82   :  { %v64_v30 = vld [vmem:[#allocation2] sm:$0x3] }
  0x83   :  { %v66_v31 = vsel %vm65_vm3, %v64_v30, 0.0 }
  0x84   :  { %67 = vadd.xlane.f32.xlu0 %v66_v31 }
  0xf7   :  { %v68_v32 = vpop.xlane.xlu0 %67 }
  0xf8   :  { %v69_v33 = vrot.slane %v68_v32, 4 }
  0xfa   :  { %v70_v34 = vadd.f32 %v69_v33, %v68_v32 }
  0xfc   :  { %v71_v35 = vrot.slane %v70_v34, 2 }
  0xfe   :  { %v72_v36 = vadd.f32 %v71_v35, %v70_v34 }
 0x100   :  { %v73_v37 = vrot.slane %v72_v36, 1 }
 0x102   :  { %v74_v38 = vadd.f32 %v73_v37, %v72_v36 }
 0x104   :  { %94 = vpush %v74_v38 }
 0x135   :  { %s95_s18 = spop %94 }
 0x136   :  { %s76_s19 = smul.f32 0.0625, %s95_s18 }
 0x138   :  { %78 = sst [smem:[#allocation3]] %s76_s19 }
 0x139   :  { %87 = dma.smem_to_hbm %s121_s20, 16, %s85_s17, [#allocation4]  }
 0x13a   :  { %117 = dma.done.wait [#allocation4], 16  }
 0x13b   :  { %118 = vsyncadd [#allocation4], 4294967280 }
 0x13c   :  { %92 = sfence }
 0x13d   :  { %93 = vsyncpa [#allocation4], 1 }

</bundles_post_ra>
